<compile_context>
chip_gen: v6e
topology: v6e:2x2x1
jax: 0.10.0
libtpu: 0.0.40
codegen_flags: <defaults>
</compile_context>

<pallas_src>
import jax
import jax.numpy as jnp
from jax.experimental import pallas as pl
from jax.experimental.pallas import tpu as pltpu


def _round_up(x, m):
    return (x + m - 1) // m * m


def hnn_kernel(w1_ref, w2_ref, b_ref, xt_ref, o_ref):
    # xt_ref: (D, S, 128) f32 VMEM   -- batch on (sublane, lane)
    # o_ref : (S, 128)    f32 VMEM
    # w1_ref: (1, D) SMEM, w2_ref: (D, D) SMEM (symmetric-folded), b_ref: (1,1) SMEM
    D, S, L = xt_ref.shape
    CH = min(32, S)                      # sublane chunk: bounds live vregs (~24)

    def emit(r0, ch):
        # Load each feature plane once for this chunk (free leading-axis index,
        # static sublane slice -> plain vector loads, no relayout).
        xs = [xt_ref[j, r0:r0 + ch, :] for j in range(D)]
        # Bias-splat init (drops a separate final add pass).
        acc = jnp.full((ch, L), b_ref[0, 0], jnp.float32)
        for j in range(D):               # static unroll, D is tiny
            inner = w1_ref[0, j] + w2_ref[j, j] * xs[j]
            for k in range(j + 1, D):    # upper triangle only (symmetric fold)
                inner = inner + w2_ref[j, k] * xs[k]
            acc = acc + xs[j] * inner
        o_ref[r0:r0 + ch, :] = acc.astype(o_ref.dtype)

    n_full = S // CH
    for c in range(n_full):
        emit(c * CH, CH)
    rem = S - n_full * CH                # remainder is a multiple of 8 sublanes
    if rem:
        emit(n_full * CH, rem)


def hnn_forward(x, w, b, *, block_rows=256):
    """x: (B, D) f32, w: (1, D*D + D) f32, b: (1,) f32  ->  (B, 1) f32."""
    B, D = x.shape
    w1 = w[:, :D].reshape(1, D).astype(jnp.float32)          # linear part
    w2 = w[0, D:].reshape(D, D).astype(jnp.float32)          # quadratic (row-major kron)
    # Symmetric fold: kernel only touches k >= j.
    w2_eff = w2 + w2.T - jnp.diag(jnp.diag(w2))
    b2 = b.reshape(1, 1).astype(jnp.float32)

    # Pad batch only to vreg granularity (8 sublanes x 128 lanes).
    rows = pl.cdiv(B, 128)
    rows_pad = _round_up(rows, 8)
    b_pad = rows_pad * 128
    S = min(block_rows, rows_pad)        # multiple of 8, or the full extent

    # Fused pad + reshape + transpose into the dense (D, rows_pad, 128) layout.
    xt = (jnp.pad(x, ((0, b_pad - B), (0, 0)))
          .reshape(rows_pad, 128, D)
          .transpose(2, 0, 1))

    cost = pl.CostEstimate(
        flops=D * (D + 3) * b_pad,                  # ~14 FMAs per batch element
        transcendentals=0,
        bytes_accessed=(D + 1) * b_pad * 4,         # read x, write H
    )

    out = pl.pallas_call(
        hnn_kernel,
        out_shape=jax.ShapeDtypeStruct((rows_pad, 128), jnp.float32),
        grid=(pl.cdiv(rows_pad, S),),               # partial last block allowed
        in_specs=[
            pl.BlockSpec(memory_space=pltpu.MemorySpace.SMEM),   # w1 (resident)
            pl.BlockSpec(memory_space=pltpu.MemorySpace.SMEM),   # w2_eff (resident)
            pl.BlockSpec(memory_space=pltpu.MemorySpace.SMEM),   # bias
            pl.BlockSpec((D, S, 128), lambda i: (0, i, 0)),      # x^T batch tiles
        ],
        out_specs=pl.BlockSpec((S, 128), lambda i: (i, 0)),
        compiler_params=pltpu.CompilerParams(
            dimension_semantics=("parallel",),
        ),
        cost_estimate=cost,
    )(w1, w2_eff, b2, xt)

    return out.reshape(b_pad, 1)[:B]


def _reference(x, w, b):
    # Literal PyTorch forward: kron -> concat -> linear.
    B, D = x.shape
    x2 = (x[:, :, None] * x[:, None, :]).reshape(B, D * D)
    x_all = jnp.concatenate([x, x2], axis=-1)
    return x_all @ w.T + b


if __name__ == "__main__":
    dim = 4
    in_features = dim * dim + dim
    bound = in_features ** -0.5

    key = jax.random.PRNGKey(0)
    kw, kb, kx1, kx2 = jax.random.split(key, 4)

    # Deterministic synthetic parameters (nn.Linear-style uniform init).
    w = jax.random.uniform(kw, (1, in_features), minval=-bound, maxval=bound,
                           dtype=jnp.float32)
    b = jax.random.uniform(kb, (1,), minval=-bound, maxval=bound,
                           dtype=jnp.float32)

    fwd = jax.jit(hnn_forward)

    ok = True
    for kx, batch in ((kx1, 8), (kx2, 333)):        # small + non-128-multiple batch
        x = jax.random.normal(kx, (batch, dim), dtype=jnp.float32)
        out = jax.block_until_ready(fwd(x, w, b))
        ref = _reference(x, w, b)
        ok &= (out.shape == (batch, 1))
        ok &= bool(jnp.allclose(out, ref, atol=1e-5, rtol=1e-5))

    assert ok
    print("KERNEL_OK")
</pallas_src>

<mosaic_0001>
module attributes {stable_mosaic.version = 11 : i64} {
  func.func @hnn_kernel(%arg0: i32, %arg1: memref<1x4xf32, #tpu.memory_space<smem>>, %arg2: memref<4x4xf32, #tpu.memory_space<smem>>, %arg3: memref<1x1xf32, #tpu.memory_space<smem>>, %arg4: memref<4x8x128xf32, #tpu.memory_space<vmem>>, %arg5: memref<8x128xf32, #tpu.memory_space<vmem>>) attributes {dimension_semantics = [#tpu.dimension_semantics<parallel>], iteration_bounds = array<i64: 1>, scalar_prefetch = 0 : i64, scratch_operands = 0 : i64, tpu.core_type = #tpu.core_type<tc>, window_params = [{transform_indices = @transform_0, window_bounds = array<i64: 1, 4>}, {transform_indices = @transform_1, window_bounds = array<i64: 4, 4>}, {transform_indices = @transform_2, window_bounds = array<i64: 1, 1>}, {transform_indices = @transform_3, window_bounds = array<i64: 4, 8, 128>}, {transform_indices = @transform_4, window_bounds = array<i64: 8, 128>}]} {
    %c0 = arith.constant 0 : index
    %c0_0 = arith.constant 0 : index
    %c0_1 = arith.constant 0 : index
    %0 = vector.load %arg4[%c0, %c0_0, %c0_1] : memref<4x8x128xf32, #tpu.memory_space<vmem>>, vector<1x8x128xf32>
    %1 = vector.shape_cast %0 : vector<1x8x128xf32> to vector<8x128xf32>
    %c1 = arith.constant 1 : index
    %c0_2 = arith.constant 0 : index
    %c0_3 = arith.constant 0 : index
    %2 = vector.load %arg4[%c1, %c0_2, %c0_3] : memref<4x8x128xf32, #tpu.memory_space<vmem>>, vector<1x8x128xf32>
    %3 = vector.shape_cast %2 : vector<1x8x128xf32> to vector<8x128xf32>
    %c2 = arith.constant 2 : index
    %c0_4 = arith.constant 0 : index
    %c0_5 = arith.constant 0 : index
    %4 = vector.load %arg4[%c2, %c0_4, %c0_5] : memref<4x8x128xf32, #tpu.memory_space<vmem>>, vector<1x8x128xf32>
    %5 = vector.shape_cast %4 : vector<1x8x128xf32> to vector<8x128xf32>
    %c3 = arith.constant 3 : index
    %c0_6 = arith.constant 0 : index
    %c0_7 = arith.constant 0 : index
    %6 = vector.load %arg4[%c3, %c0_6, %c0_7] : memref<4x8x128xf32, #tpu.memory_space<vmem>>, vector<1x8x128xf32>
    %7 = vector.shape_cast %6 : vector<1x8x128xf32> to vector<8x128xf32>
    %c0_8 = arith.constant 0 : index
    %c0_9 = arith.constant 0 : index
    %8 = memref.load %arg3[%c0_8, %c0_9] : memref<1x1xf32, #tpu.memory_space<smem>>
    %9 = vector.broadcast %8 : f32 to vector<8x128xf32>
    %c0_10 = arith.constant 0 : index
    %c0_11 = arith.constant 0 : index
    %10 = memref.load %arg1[%c0_10, %c0_11] : memref<1x4xf32, #tpu.memory_space<smem>>
    %c0_12 = arith.constant 0 : index
    %c0_13 = arith.constant 0 : index
    %11 = memref.load %arg2[%c0_12, %c0_13] : memref<4x4xf32, #tpu.memory_space<smem>>
    %12 = vector.broadcast %11 : f32 to vector<8x128xf32>
    %13 = arith.mulf %12, %1 : vector<8x128xf32>
    %14 = vector.broadcast %10 : f32 to vector<8x128xf32>
    %15 = arith.addf %14, %13 : vector<8x128xf32>
    %c0_14 = arith.constant 0 : index
    %c1_15 = arith.constant 1 : index
    %16 = memref.load %arg2[%c0_14, %c1_15] : memref<4x4xf32, #tpu.memory_space<smem>>
    %17 = vector.broadcast %16 : f32 to vector<8x128xf32>
    %18 = arith.mulf %17, %3 : vector<8x128xf32>
    %19 = arith.addf %15, %18 : vector<8x128xf32>
    %c0_16 = arith.constant 0 : index
    %c2_17 = arith.constant 2 : index
    %20 = memref.load %arg2[%c0_16, %c2_17] : memref<4x4xf32, #tpu.memory_space<smem>>
    %21 = vector.broadcast %20 : f32 to vector<8x128xf32>
    %22 = arith.mulf %21, %5 : vector<8x128xf32>
    %23 = arith.addf %19, %22 : vector<8x128xf32>
    %c0_18 = arith.constant 0 : index
    %c3_19 = arith.constant 3 : index
    %24 = memref.load %arg2[%c0_18, %c3_19] : memref<4x4xf32, #tpu.memory_space<smem>>
    %25 = vector.broadcast %24 : f32 to vector<8x128xf32>
    %26 = arith.mulf %25, %7 : vector<8x128xf32>
    %27 = arith.addf %23, %26 : vector<8x128xf32>
    %28 = arith.mulf %1, %27 : vector<8x128xf32>
    %29 = arith.addf %9, %28 : vector<8x128xf32>
    %c0_20 = arith.constant 0 : index
    %c1_21 = arith.constant 1 : index
    %30 = memref.load %arg1[%c0_20, %c1_21] : memref<1x4xf32, #tpu.memory_space<smem>>
    %c1_22 = arith.constant 1 : index
    %c1_23 = arith.constant 1 : index
    %31 = memref.load %arg2[%c1_22, %c1_23] : memref<4x4xf32, #tpu.memory_space<smem>>
    %32 = vector.broadcast %31 : f32 to vector<8x128xf32>
    %33 = arith.mulf %32, %3 : vector<8x128xf32>
    %34 = vector.broadcast %30 : f32 to vector<8x128xf32>
    %35 = arith.addf %34, %33 : vector<8x128xf32>
    %c1_24 = arith.constant 1 : index
    %c2_25 = arith.constant 2 : index
    %36 = memref.load %arg2[%c1_24, %c2_25] : memref<4x4xf32, #tpu.memory_space<smem>>
    %37 = vector.broadcast %36 : f32 to vector<8x128xf32>
    %38 = arith.mulf %37, %5 : vector<8x128xf32>
    %39 = arith.addf %35, %38 : vector<8x128xf32>
    %c1_26 = arith.constant 1 : index
    %c3_27 = arith.constant 3 : index
    %40 = memref.load %arg2[%c1_26, %c3_27] : memref<4x4xf32, #tpu.memory_space<smem>>
    %41 = vector.broadcast %40 : f32 to vector<8x128xf32>
    %42 = arith.mulf %41, %7 : vector<8x128xf32>
    %43 = arith.addf %39, %42 : vector<8x128xf32>
    %44 = arith.mulf %3, %43 : vector<8x128xf32>
    %45 = arith.addf %29, %44 : vector<8x128xf32>
    %c0_28 = arith.constant 0 : index
    %c2_29 = arith.constant 2 : index
    %46 = memref.load %arg1[%c0_28, %c2_29] : memref<1x4xf32, #tpu.memory_space<smem>>
    %c2_30 = arith.constant 2 : index
    %c2_31 = arith.constant 2 : index
    %47 = memref.load %arg2[%c2_30, %c2_31] : memref<4x4xf32, #tpu.memory_space<smem>>
    %48 = vector.broadcast %47 : f32 to vector<8x128xf32>
    %49 = arith.mulf %48, %5 : vector<8x128xf32>
    %50 = vector.broadcast %46 : f32 to vector<8x128xf32>
    %51 = arith.addf %50, %49 : vector<8x128xf32>
    %c2_32 = arith.constant 2 : index
    %c3_33 = arith.constant 3 : index
    %52 = memref.load %arg2[%c2_32, %c3_33] : memref<4x4xf32, #tpu.memory_space<smem>>
    %53 = vector.broadcast %52 : f32 to vector<8x128xf32>
    %54 = arith.mulf %53, %7 : vector<8x128xf32>
    %55 = arith.addf %51, %54 : vector<8x128xf32>
    %56 = arith.mulf %5, %55 : vector<8x128xf32>
    %57 = arith.addf %45, %56 : vector<8x128xf32>
    %c0_34 = arith.constant 0 : index
    %c3_35 = arith.constant 3 : index
    %58 = memref.load %arg1[%c0_34, %c3_35] : memref<1x4xf32, #tpu.memory_space<smem>>
    %c3_36 = arith.constant 3 : index
    %c3_37 = arith.constant 3 : index
    %59 = memref.load %arg2[%c3_36, %c3_37] : memref<4x4xf32, #tpu.memory_space<smem>>
    %60 = vector.broadcast %59 : f32 to vector<8x128xf32>
    %61 = arith.mulf %60, %7 : vector<8x128xf32>
    %62 = vector.broadcast %58 : f32 to vector<8x128xf32>
    %63 = arith.addf %62, %61 : vector<8x128xf32>
    %64 = arith.mulf %7, %63 : vector<8x128xf32>
    %65 = arith.addf %57, %64 : vector<8x128xf32>
    %c0_38 = arith.constant 0 : index
    %c0_39 = arith.constant 0 : index
    %66 = vector.load %arg5[%c0_38, %c0_39] : memref<8x128xf32, #tpu.memory_space<vmem>>, vector<8x128xf32>
    tpu.vector_store %arg5[%c0_38, %c0_39], %65 {strides = array<i32>} : memref<8x128xf32, #tpu.memory_space<vmem>>, vector<8x128xf32>,
    return
  }
  func.func @transform_0(%arg0: i32) -> (i32, i32) {
    %c0_i32 = arith.constant 0 : i32
    %c0_i32_0 = arith.constant 0 : i32
    %c0_i32_1 = arith.constant 0 : i32
    return %c0_i32, %c0_i32_0 : i32, i32
  }
  func.func @transform_1(%arg0: i32) -> (i32, i32) {
    %c0_i32 = arith.constant 0 : i32
    %c0_i32_0 = arith.constant 0 : i32
    %c0_i32_1 = arith.constant 0 : i32
    return %c0_i32, %c0_i32_0 : i32, i32
  }
  func.func @transform_2(%arg0: i32) -> (i32, i32) {
    %c0_i32 = arith.constant 0 : i32
    %c0_i32_0 = arith.constant 0 : i32
    %c0_i32_1 = arith.constant 0 : i32
    return %c0_i32, %c0_i32_0 : i32, i32
  }
  func.func @transform_3(%arg0: i32) -> (i32, i32, i32) {
    %c0_i32 = arith.constant 0 : i32
    %c0_i32_0 = arith.constant 0 : i32
    %c0_i32_1 = arith.constant 0 : i32
    return %c0_i32, %arg0, %c0_i32_0 : i32, i32, i32
  }
  func.func @transform_4(%arg0: i32) -> (i32, i32) {
    %c0_i32 = arith.constant 0 : i32
    %c0_i32_0 = arith.constant 0 : i32
    return %arg0, %c0_i32 : i32, i32
  }
}

</mosaic_0001>

<bundles_post_ra>
// kernel: squeeze.1
= control target key start
LH: loop header
LB: loop body
LE: loop exit
PB: predicated region body
PF: predicated region fallthrough
CT: control target
= control target key end

     0   :  { %s40_s8 = smov 116   ;;  %vm8_vm0 = vcmask 31744   ;;  %s41_s9 = smov 120   ;;  %s58_s0 = inlined_call_operand.vmem [shape: f32[16], index: 0, kind: input, shape index: {}]   ;;  %s59_s1 = inlined_call_operand.vmem [shape: f32[4,4], index: 1, kind: output, shape index: {}]  }
   0x1   :  { %v5_v0 = vld [vmem:[%s58_s0] sm:$0x1]  ;;  %s39_s0 = smov 124  }
   0x2   :  { %6 = vst [vmem:[#allocation1] sm:$0x1] %v5_v0 }
   0x9   :  { %v10_v1 = vld [vmem:[#allocation1] sm:$0x1]  }
   0xa   :  { %v22_v2 = vld [vmem:[#allocation1] sm:$0x1]   ;;  %11 = vrot.lane.b32.xlu0 %v10_v1, %s39_s0 }
   0xb   :  { %23 = vrot.lane.b32.xlu1 %v22_v2, %s40_s8  ;;  %v7_v3 = vld [vmem:[#allocation1] sm:$0x1]  }
   0xc   :  { %v16_v4 = vld [vmem:[#allocation1] sm:$0x1]   ;;  %9 = vst.msk [vmem:[#allocation0] sm:$0x1] %vm8_vm0, %v7_v3  }
   0xe   :  { %17 = vrot.lane.b32.xlu0 %v16_v4, %s41_s9 }
  0x7c   :  { %v12_v5 = vpop.permute.xlu0 %11  }
  0x7d   :  { %v24_v6 = vpop.permute.xlu1 %23   ;;  %15 = vst.msk [vmem:[#allocation0 + $0x1] sm:$0x1] %vm8_vm0, %v12_v5  }
  0x7e   :  { %27 = vst.msk [vmem:[#allocation0 + $0x3] sm:$0x1] %vm8_vm0, %v24_v6  }
  0x80   :  { %v18_v7 = vpop.permute.xlu0 %17  }
  0x81   :  { %21 = vst.msk [vmem:[#allocation0 + $0x2] sm:$0x1] %vm8_vm0, %v18_v7  }
  0x88   :  { %v32_v8 = vld [vmem:[#allocation0] sm:$0xf] }
  0x89   :  { %35 = vst [vmem:[%s59_s1] sm:$0xf] %v32_v8 }

// kernel: hnn_forward.1
= control target key start
LH: loop header
LB: loop body
LE: loop exit
PB: predicated region body
PF: predicated region fallthrough
CT: control target
= control target key end

     0   :  { %10 = vsyncpa [#allocation4], 0  ;;  %s214_s0 = inlined_call_operand.vmem [shape: f32[1,4], index: 0, kind: input, shape index: {}]   ;;  %s215_s1 = inlined_call_operand.vmem [shape: f32[4,4], index: 1, kind: input, shape index: {}]   ;;  %s216_s2 = inlined_call_operand.<no memory space> [shape: f32[1,1], index: 2, kind: input, shape index: {}]   ;;  %s217_s3 = inlined_call_operand.vmem [shape: f32[4,8,128], index: 3, kind: input, shape index: {}]   ;;  %s218_s4 = inlined_call_operand.vmem [shape: f32[8,128], index: 4, kind: output, shape index: {}]  }
   0x1   :  { %s18_s17 = sshll.u32 %s214_s0, 4  ;;  %s19_s17 = int_to_ptr.vmem [resolvable:$true] %s18_s17 }
   0x2   :  { %11 = vsyncpa [#allocation6], 0  ;;  %s28_s20 = sshll.u32 %s215_s1, 4  ;;  %s132_s21 = scalar_lea.vmem %s19_s17, 16  ;;  %s29_s20 = int_to_ptr.vmem [resolvable:$true] %s28_s20 }
   0x3   :  { %p133_p0 = scmp.ne.s32.totalorder %s19_s17, %s132_s21  ;;  %p137_p1 = scmp.lt.s32.totalorder %s19_s17, %s19_s17 }
   0x4   :  { %p138_p2 = scmp.lt.s32.totalorder %s132_s21, %s132_s21 }
   0x6   :  { %p139_p3 = por %p138_p2, %p137_p1 }
   0x8   :  { %p140_p4 = pnand %p139_p3, %p133_p0 }
   0xa   :  { %143 = shalt.err (!%p140_p4)
}
   0xb   :  { %s160_s22 = smov [#allocation3]   ;;  %s144_s23 = scalar_lea.vmem %s29_s20, 64 }
   0xc   :  { %21 = dma.vmem_to_smem %s19_s17, 16, %s160_s22, [#allocation4]  }
   0xd   :  { %p145_p5 = scmp.ne.s32.totalorder %s29_s20, %s144_s23  ;;  %p149_p6 = scmp.lt.s32.totalorder %s29_s20, %s29_s20 }
   0xe   :  { %p150_p7 = scmp.lt.s32.totalorder %s144_s23, %s144_s23 }
  0x10   :  { %p151_p8 = por %p150_p7, %p149_p6 }
  0x12   :  { %p152_p9 = pnand %p151_p8, %p145_p5 }
  0x14   :  { %155 = shalt.err (!%p152_p9)
}
  0x15   :  { %s161_s0 = smov [#allocation5]  }
  0x16   :  { %31 = dma.vmem_to_smem %s29_s20, 64, %s161_s0, [#allocation6]  }
  0x17   :  { %156 = dma.done.wait [#allocation4], 16  }
  0x18   :  { %157 = vsyncadd [#allocation4], 4294967280 }
  0x19   :  { %158 = dma.done.wait [#allocation6], 64  }
  0x1a   :  { %159 = vsyncadd [#allocation6], 4294967232 }
  0x1b   :  { %42 = sfence }
  0x1c   :  { %s52_s1 = sld [smem:[#allocation3]]  ;;  %v43_v0 = vld [vmem:[%s217_s3] sm:$0xff]  ;;  %v115_v1 = vld [vmem:[%s217_s3 + $0x8] sm:$0xff]  ;;  %v116_v2 = vld [vmem:[%s217_s3 + $0x10] sm:$0xff]  ;;  %v51_v27 = vstv %s216_s2 }
  0x1d   :  { %s53_s24 = sld [smem:[#allocation5]]  ;;  %v117_v7 = vld [vmem:[%s217_s3 + $0x18] sm:$0xff] }
  0x1e   :  { %s118_s25 = sld [smem:[#allocation5 + $0x1]] }
  0x1f   :  { %s119_s26 = sld [smem:[#allocation5 + $0x2]] }
  0x20   :  { %s120_s27 = sld [smem:[#allocation5 + $0x3]] }
  0x21   :  { %s196_s30 = sld [smem:[#allocation3 + $0x1]] }
  0x22   :  { %s122_s7 = sld [smem:[#allocation5 + $0x81]]  ;;  %v56_v4 = vstv %s52_s1 }
  0x23   :  { %v54_v3 = vstv %s53_s24  ;;  %s123_s10 = sld [smem:[#allocation5 + $0x82]] }
  0x24   :  { %v55_v5 = vmul.f32 %v54_v3, %v43_v0  ;;  %v59_v6 = vstv %s118_s25  ;;  %s124_s11 = sld [smem:[#allocation5 + $0x83]] }
  0x25   :  { %v60_v8 = vmul.f32 %v115_v1, %v59_v6  ;;  %v63_v9 = vstv %s119_s26  ;;  %s125_s14 = sld [smem:[#allocation3 + $0x2]] }
  0x26   :  { %v57_v10 = vadd.f32 %v56_v4, %v55_v5  ;;  %v64_v11 = vmul.f32 %v116_v2, %v63_v9  ;;  %v67_v12 = vstv %s120_s27  ;;  %s126_s15 = sld [smem:[#allocation5 + $0x102]] }
  0x27   :  { %s127_s16 = sld [smem:[#allocation5 + $0x103]]  ;;  %v68_v14 = vmul.f32 %v117_v7, %v67_v12  ;;  %v76_v16 = vstv %s196_s30 }
  0x28   :  { %v61_v13 = vadd.f32 %v60_v8, %v57_v10  ;;  %v74_v15 = vstv %s122_s7  ;;  %s128_s17 = sld [smem:[#allocation3 + $0x3]] }
  0x29   :  { %v75_v17 = vmul.f32 %v115_v1, %v74_v15  ;;  %v79_v18 = vstv %s123_s10  ;;  %s129_s18 = sld [smem:[#allocation5 + $0x183]] }
  0x2a   :  { %v65_v19 = vadd.f32 %v64_v11, %v61_v13  ;;  %v80_v20 = vmul.f32 %v116_v2, %v79_v18  ;;  %v83_v21 = vstv %s124_s11 }
  0x2b   :  { %v77_v22 = vadd.f32 %v76_v16, %v75_v17  ;;  %v84_v23 = vmul.f32 %v117_v7, %v83_v21  ;;  %v92_v26 = vstv %s125_s14 }
  0x2c   :  { %v69_v24 = vadd.f32 %v68_v14, %v65_v19  ;;  %v90_v25 = vstv %s126_s15 }
  0x2d   :  { %v81_v28 = vadd.f32 %v80_v20, %v77_v22  ;;  %v91_v29 = vmul.f32 %v116_v2, %v90_v25  ;;  %v95_v30 = vstv %s127_s16 }
  0x2e   :  { %v70_v31 = vmul.f32 %v69_v24, %v43_v0  ;;  %v96_v32 = vmul.f32 %v117_v7, %v95_v30  ;;  %v104_v36 = vstv %s128_s17 }
  0x2f   :  { %v85_v33 = vadd.f32 %v84_v23, %v81_v28  ;;  %v93_v34 = vadd.f32 %v92_v26, %v91_v29  ;;  %v102_v35 = vstv %s129_s18 }
  0x30   :  { %v71_v37 = vadd.f32 %v70_v31, %v51_v27  ;;  %v103_v38 = vmul.f32 %v117_v7, %v102_v35 }
  0x31   :  { %v86_v39 = vmul.f32 %v115_v1, %v85_v33  ;;  %v97_v40 = vadd.f32 %v96_v32, %v93_v34 }
  0x32   :  { %v105_v41 = vadd.f32 %v104_v36, %v103_v38 }
  0x33   :  { %v87_v42 = vadd.f32 %v86_v39, %v71_v37  ;;  %v98_v43 = vmul.f32 %v116_v2, %v97_v40 }
  0x34   :  { %v106_v44 = vmul.f32 %v117_v7, %v105_v41 }
  0x35   :  { %v99_v45 = vadd.f32 %v98_v43, %v87_v42 }
  0x37   :  { %v107_v46 = vadd.f32 %v106_v44, %v99_v45 }
  0x39   :  { %108 = vst [vmem:[%s218_s4] sm:$0xff] %v107_v46 }
  0x3a   :  { %113 = vsyncpa [#allocation4], 1 }
  0x3b   :  { %114 = vsyncpa [#allocation6], 1 }

</bundles_post_ra>
